<compile_context>
chip_gen: v7x
topology: tpu7x:2x2x1
jax: 0.10.0
libtpu: 0.0.40
codegen_flags: <defaults>
</compile_context>

<pallas_src>
import jax
import jax.numpy as jnp
from jax.experimental import pallas as pl
from jax.experimental.pallas import tpu as pltpu


def pimodel_loss_kernel(x_ref, w_ref, b_ref, y_ref, mask_ref, o_ref, logits_ref):
    # x:(TB,D) bf16, w:(D,C) bf16, b:(1,C) f32, y:(TB,C) bf16, mask:(TB,1) f32
    # o:(8,C) f32 per-tile partial sums, logits_ref:(TB,C) f32 VMEM scratch.
    tb = x_ref.shape[0]
    c = o_ref.shape[1]

    # ---- model(x): linear head -> logits (only y_hat of model(x) is needed) ----
    # Full-tile matmul (MXU, f32 accumulation), written once to VMEM scratch so the
    # epilogue can be chunked without keeping (TB, C) f32 values live in vregs.
    logits_ref[...] = jnp.dot(x_ref[...], w_ref[...],
                              preferred_element_type=jnp.float32) + b_ref[...]

    # ---- chunked epilogue: softmax over classes + masked squared error + row reduce ----
    chunk = 32 if tb % 32 == 0 else (16 if tb % 16 == 0 else 8)   # tb is a multiple of 8

    def body(g, acc):
        r = pl.multiple_of(g * chunk, chunk)
        lg = logits_ref[pl.ds(r, chunk), :]                              # (chunk, C) f32
        m = jnp.max(lg, axis=1, keepdims=True)
        e = jnp.exp(lg - m)
        inv = pl.reciprocal(jnp.sum(e, axis=1, keepdims=True), approx=True)  # EUP slot
        p = e * inv                                                      # softmax probs
        d = p - y_ref[pl.ds(r, chunk), :].astype(jnp.float32)
        sq = d * d * mask_ref[pl.ds(r, chunk), :]                        # (chunk, C)
        # reduce chunk rows -> 8 sublanes (a few static vreg adds)
        part = sq[0:8, :]
        for gg in range(1, chunk // 8):
            part = part + sq[gg * 8:(gg + 1) * 8, :]
        return acc + part

    o_ref[...] = jax.lax.fori_loop(0, tb // chunk, body,
                                   jnp.zeros((8, c), jnp.float32), unroll=True)


def _round_up(v, m):
    return (v + m - 1) // m * m


def _build_call(nt, tb, D, C, vmem_limit, single_buffer_resident):
    if single_buffer_resident:
        w_spec = pl.BlockSpec((D, C), lambda i: (0, 0), pipeline_mode=pl.Buffered(1))
        b_spec = pl.BlockSpec((1, C), lambda i: (0, 0), pipeline_mode=pl.Buffered(1))
    else:
        w_spec = pl.BlockSpec((D, C), lambda i: (0, 0))
        b_spec = pl.BlockSpec((1, C), lambda i: (0, 0))
    return pl.pallas_call(
        pimodel_loss_kernel,
        out_shape=jax.ShapeDtypeStruct((nt * 8, C), jnp.float32),
        grid=(nt,),
        in_specs=[
            pl.BlockSpec((tb, D), lambda i: (i, 0)),   # x tile    (pipelined)
            w_spec,                                    # weights   (resident)
            b_spec,                                    # bias      (resident)
            pl.BlockSpec((tb, C), lambda i: (i, 0)),   # y tile    (pipelined, bf16)
            pl.BlockSpec((tb, 1), lambda i: (i, 0)),   # mask tile
        ],
        out_specs=pl.BlockSpec((8, C), lambda i: (i, 0)),
        scratch_shapes=[pltpu.VMEM((tb, C), jnp.float32)],   # logits scratch
        compiler_params=pltpu.CompilerParams(
            dimension_semantics=("parallel",),         # independent per-tile partials (v7x 2 TCs)
            vmem_limit_bytes=vmem_limit),
    )


def pimodel_loss(x, w, b, y, mask, *, tb=256):
    """x:[B,D] f32, w:[D,C] f32, b:[C] f32, y:[B,C] f32, mask:[B] f32 -> scalar f32 loss."""
    B, D = x.shape
    C = w.shape[1]

    # Clamp the batch tile to the (8-aligned) batch so small problems stay single-tile;
    # at realistic B keep tb large (128-256 on v7x, up to 512 on v5e/v6e) so nt >= 2.
    tb = min(tb, _round_up(B, 8))
    tb = _round_up(tb, 8)
    Bp = _round_up(B, tb)
    nt = Bp // tb

    # ---- input prep: dtype casts only; padded copies only when B % tb != 0 ----
    if Bp == B:
        x_p = x.astype(jnp.bfloat16)
        y_p = y.astype(jnp.bfloat16)
        m_p = mask.astype(jnp.float32)[:, None]
    else:
        # Padded rows: x=0 (logits=bias, harmless), y=0, mask=0 -> zero contribution.
        x_p = jnp.zeros((Bp, D), jnp.bfloat16).at[:B].set(x.astype(jnp.bfloat16))
        y_p = jnp.zeros((Bp, C), jnp.bfloat16).at[:B].set(y.astype(jnp.bfloat16))
        m_p = jnp.zeros((Bp, 1), jnp.float32).at[:B, 0].set(mask.astype(jnp.float32))
    w_p = w.astype(jnp.bfloat16)
    b_p = b.astype(jnp.float32).reshape(1, C)

    # ---- VMEM budget (lane-padded estimate, 2x headroom, 32 MiB floor / 128 MiB cap) ----
    lc = _round_up(C, 128)
    ld = _round_up(D, 128)
    est = (2 * (tb * ld * 2            # x tile, bf16, double-buffered
                + tb * lc * 2          # y tile, bf16
                + tb * 128 * 4         # mask tile (lane-pads to 128)
                + 8 * lc * 4)          # out tile
           + 2 * (D * lc * 2 + 8 * lc * 4)   # w + b (worst case double-buffered)
           + tb * lc * 4)              # logits scratch
    vmem_limit = int(min(128 << 20, max(32 << 20, 2 * est)))

    try:
        call = _build_call(nt, tb, D, C, vmem_limit, single_buffer_resident=True)
        partials = call(x_p, w_p, b_p, y_p, m_p)
    except Exception:
        # pipeline_mode=pl.Buffered(1) not supported on this JAX: default double buffering.
        call = _build_call(nt, tb, D, C, vmem_limit, single_buffer_resident=False)
        partials = call(x_p, w_p, b_p, y_p, m_p)

    # Final tiny (nt*8, C) reduction; 1/C and 1/B folded into a single scale.
    # (For very large B/nt consider a pairwise/per-lane reduction to bound f32 error.)
    return jnp.sum(partials) * (1.0 / (B * C))


def pimodel_loss_ref(x, w, b, y, mask):
    """Pure-JAX reference mirroring the PyTorch forward (full f32)."""
    y_hat = x @ w + b
    p = jax.nn.softmax(y_hat, axis=1)
    per_sample = jnp.mean((p - y) ** 2, axis=1)
    return jnp.mean(per_sample * mask)


if __name__ == "__main__":
    key = jax.random.PRNGKey(0)
    kx, kw, kb, ky, km = jax.random.split(key, 5)

    B, D, C = 64, 32, 10   # batch, feature dim, classes (small Pi-model style head)

    x = jax.random.normal(kx, (B, D), dtype=jnp.float32)
    # Deterministic synthetic "model" parameters (Linear D -> C stands in for model(x)).
    w = jax.random.normal(kw, (D, C), dtype=jnp.float32) * 0.1
    bias = jax.random.normal(kb, (C,), dtype=jnp.float32) * 0.1
    # Soft targets (e.g. previous-epoch predictions in the Pi-model setting).
    y = jax.nn.softmax(jax.random.normal(ky, (B, C), dtype=jnp.float32), axis=1)
    # Binary mask over the batch (unlabeled-sample indicator).
    mask = (jax.random.uniform(km, (B,)) > 0.5).astype(jnp.float32)

    loss = jax.block_until_ready(pimodel_loss(x, w, bias, y, mask))
    ref = jax.block_until_ready(pimodel_loss_ref(x, w, bias, y, mask))
    # Looser tolerance: bf16 matmul / y operands + approx reciprocal vs f32 reference.
    assert jnp.allclose(loss, ref, rtol=2e-2, atol=5e-4), (loss, ref)

    print("KERNEL_OK")
</pallas_src>

<mosaic_0001>
module attributes {stable_mosaic.version = 11 : i64} {
  func.func @pimodel_loss_kernel(%arg0: i32, %arg1: memref<64x32xbf16, #tpu.memory_space<vmem>>, %arg2: memref<32x10xbf16, #tpu.memory_space<vmem>>, %arg3: memref<1x10xf32, #tpu.memory_space<vmem>>, %arg4: memref<64x10xbf16, #tpu.memory_space<vmem>>, %arg5: memref<64x1xf32, #tpu.memory_space<vmem>>, %arg6: memref<8x10xf32, #tpu.memory_space<vmem>>, %arg7: memref<64x10xf32, #tpu.memory_space<vmem>>) attributes {dimension_semantics = [#tpu.dimension_semantics<parallel>], iteration_bounds = array<i64: 1>, scalar_prefetch = 0 : i64, scratch_operands = 1 : i64, tpu.core_type = #tpu.core_type<tc>, window_params = [{transform_indices = @transform_0, window_bounds = array<i64: 64, 32>}, {pipeline_mode = #tpu.pipeline_mode<synchronous>, transform_indices = @transform_1, window_bounds = array<i64: 32, 10>}, {pipeline_mode = #tpu.pipeline_mode<synchronous>, transform_indices = @transform_2, window_bounds = array<i64: 1, 10>}, {transform_indices = @transform_3, window_bounds = array<i64: 64, 10>}, {transform_indices = @transform_4, window_bounds = array<i64: 64, 1>}, {transform_indices = @transform_5, window_bounds = array<i64: 8, 10>}]} {
    %c0 = arith.constant 0 : index
    %c0_0 = arith.constant 0 : index
    %0 = vector.load %arg1[%c0, %c0_0] : memref<64x32xbf16, #tpu.memory_space<vmem>>, vector<64x32xbf16>
    %c0_1 = arith.constant 0 : index
    %c0_2 = arith.constant 0 : index
    %1 = vector.load %arg2[%c0_1, %c0_2] : memref<32x10xbf16, #tpu.memory_space<vmem>>, vector<32x10xbf16>
    %cst = arith.constant dense<0.000000e+00> : vector<64x10xf32>
    %2 = tpu.matmul %0, %1, %cst {dimension_numbers = #tpu.dot_dimension_numbers<[1], [0], [0], [1], [0, 0, 1, 1], [], []>} : vector<64x32xbf16>, vector<32x10xbf16>, vector<64x10xf32> -> vector<64x10xf32>
    %c0_3 = arith.constant 0 : index
    %c0_4 = arith.constant 0 : index
    %3 = vector.load %arg3[%c0_3, %c0_4] : memref<1x10xf32, #tpu.memory_space<vmem>>, vector<1x10xf32>
    %4 = vector.broadcast %3 : vector<1x10xf32> to vector<64x10xf32>
    %5 = arith.addf %2, %4 : vector<64x10xf32>
    %c0_5 = arith.constant 0 : index
    %c0_6 = arith.constant 0 : index
    %6 = vector.load %arg7[%c0_5, %c0_6] : memref<64x10xf32, #tpu.memory_space<vmem>>, vector<64x10xf32>
    tpu.vector_store %arg7[%c0_5, %c0_6], %5 {strides = array<i32>} : memref<64x10xf32, #tpu.memory_space<vmem>>, vector<64x10xf32>,
    %cst_7 = arith.constant 0.000000e+00 : f32
    %7 = vector.broadcast %cst_7 : f32 to vector<8x10xf32>
    %c0_i32 = arith.constant 0 : i32
    %c32_i32 = arith.constant 32 : i32
    %8 = arith.muli %c0_i32, %c32_i32 : i32
    %9 = tpu.assume_multiple %8, 32 : i32
    %10 = arith.index_cast %9 : i32 to index
    %c0_8 = arith.constant 0 : index
    %11 = vector.load %arg7[%10, %c0_8] : memref<64x10xf32, #tpu.memory_space<vmem>>, vector<32x10xf32>
    %cst_9 = arith.constant dense<0xFF800000> : vector<32xf32>
    %12 = vector.multi_reduction <maximumf>, %11, %cst_9 [1] : vector<32x10xf32> to vector<32xf32>
    %13 = vector.shape_cast %12 : vector<32xf32> to vector<32x1xf32>
    %14 = vector.broadcast %13 : vector<32x1xf32> to vector<32x10xf32>
    %15 = arith.subf %11, %14 : vector<32x10xf32>
    %16 = math.exp %15 : vector<32x10xf32>
    %cst_10 = arith.constant dense<0.000000e+00> : vector<32xf32>
    %17 = vector.multi_reduction <add>, %16, %cst_10 [1] : vector<32x10xf32> to vector<32xf32>
    %18 = vector.shape_cast %17 : vector<32xf32> to vector<32x1xf32>
    %19 = tpu.reciprocal %18 {approx = true} : vector<32x1xf32> -> vector<32x1xf32>
    %20 = vector.broadcast %19 : vector<32x1xf32> to vector<32x10xf32>
    %21 = arith.mulf %16, %20 : vector<32x10xf32>
    %22 = arith.index_cast %9 : i32 to index
    %c0_11 = arith.constant 0 : index
    %23 = vector.load %arg4[%22, %c0_11] : memref<64x10xbf16, #tpu.memory_space<vmem>>, vector<32x10xbf16>
    %24 = arith.extf %23 : vector<32x10xbf16> to vector<32x10xf32>
    %25 = arith.subf %21, %24 : vector<32x10xf32>
    %26 = arith.mulf %25, %25 : vector<32x10xf32>
    %27 = arith.index_cast %9 : i32 to index
    %c0_12 = arith.constant 0 : index
    %28 = vector.load %arg5[%27, %c0_12] : memref<64x1xf32, #tpu.memory_space<vmem>>, vector<32x1xf32>
    %29 = vector.broadcast %28 : vector<32x1xf32> to vector<32x10xf32>
    %30 = arith.mulf %26, %29 : vector<32x10xf32>
    %31 = vector.extract_strided_slice %30 {offsets = [0, 0], sizes = [8, 10], strides = [1, 1]} : vector<32x10xf32> to vector<8x10xf32>
    %32 = vector.extract_strided_slice %30 {offsets = [8, 0], sizes = [8, 10], strides = [1, 1]} : vector<32x10xf32> to vector<8x10xf32>
    %33 = arith.addf %31, %32 : vector<8x10xf32>
    %34 = vector.extract_strided_slice %30 {offsets = [16, 0], sizes = [8, 10], strides = [1, 1]} : vector<32x10xf32> to vector<8x10xf32>
    %35 = arith.addf %33, %34 : vector<8x10xf32>
    %36 = vector.extract_strided_slice %30 {offsets = [24, 0], sizes = [8, 10], strides = [1, 1]} : vector<32x10xf32> to vector<8x10xf32>
    %37 = arith.addf %35, %36 : vector<8x10xf32>
    %38 = arith.addf %7, %37 : vector<8x10xf32>
    %c1_i32 = arith.constant 1 : i32
    %c32_i32_13 = arith.constant 32 : i32
    %39 = arith.muli %c1_i32, %c32_i32_13 : i32
    %40 = tpu.assume_multiple %39, 32 : i32
    %41 = arith.index_cast %40 : i32 to index
    %c0_14 = arith.constant 0 : index
    %42 = vector.load %arg7[%41, %c0_14] : memref<64x10xf32, #tpu.memory_space<vmem>>, vector<32x10xf32>
    %cst_15 = arith.constant dense<0xFF800000> : vector<32xf32>
    %43 = vector.multi_reduction <maximumf>, %42, %cst_15 [1] : vector<32x10xf32> to vector<32xf32>
    %44 = vector.shape_cast %43 : vector<32xf32> to vector<32x1xf32>
    %45 = vector.broadcast %44 : vector<32x1xf32> to vector<32x10xf32>
    %46 = arith.subf %42, %45 : vector<32x10xf32>
    %47 = math.exp %46 : vector<32x10xf32>
    %cst_16 = arith.constant dense<0.000000e+00> : vector<32xf32>
    %48 = vector.multi_reduction <add>, %47, %cst_16 [1] : vector<32x10xf32> to vector<32xf32>
    %49 = vector.shape_cast %48 : vector<32xf32> to vector<32x1xf32>
    %50 = tpu.reciprocal %49 {approx = true} : vector<32x1xf32> -> vector<32x1xf32>
    %51 = vector.broadcast %50 : vector<32x1xf32> to vector<32x10xf32>
    %52 = arith.mulf %47, %51 : vector<32x10xf32>
    %53 = arith.index_cast %40 : i32 to index
    %c0_17 = arith.constant 0 : index
    %54 = vector.load %arg4[%53, %c0_17] : memref<64x10xbf16, #tpu.memory_space<vmem>>, vector<32x10xbf16>
    %55 = arith.extf %54 : vector<32x10xbf16> to vector<32x10xf32>
    %56 = arith.subf %52, %55 : vector<32x10xf32>
    %57 = arith.mulf %56, %56 : vector<32x10xf32>
    %58 = arith.index_cast %40 : i32 to index
    %c0_18 = arith.constant 0 : index
    %59 = vector.load %arg5[%58, %c0_18] : memref<64x1xf32, #tpu.memory_space<vmem>>, vector<32x1xf32>
    %60 = vector.broadcast %59 : vector<32x1xf32> to vector<32x10xf32>
    %61 = arith.mulf %57, %60 : vector<32x10xf32>
    %62 = vector.extract_strided_slice %61 {offsets = [0, 0], sizes = [8, 10], strides = [1, 1]} : vector<32x10xf32> to vector<8x10xf32>
    %63 = vector.extract_strided_slice %61 {offsets = [8, 0], sizes = [8, 10], strides = [1, 1]} : vector<32x10xf32> to vector<8x10xf32>
    %64 = arith.addf %62, %63 : vector<8x10xf32>
    %65 = vector.extract_strided_slice %61 {offsets = [16, 0], sizes = [8, 10], strides = [1, 1]} : vector<32x10xf32> to vector<8x10xf32>
    %66 = arith.addf %64, %65 : vector<8x10xf32>
    %67 = vector.extract_strided_slice %61 {offsets = [24, 0], sizes = [8, 10], strides = [1, 1]} : vector<32x10xf32> to vector<8x10xf32>
    %68 = arith.addf %66, %67 : vector<8x10xf32>
    %69 = arith.addf %38, %68 : vector<8x10xf32>
    %c2_i32 = arith.constant 2 : i32
    %c0_19 = arith.constant 0 : index
    %c0_20 = arith.constant 0 : index
    %70 = vector.load %arg6[%c0_19, %c0_20] : memref<8x10xf32, #tpu.memory_space<vmem>>, vector<8x10xf32>
    tpu.vector_store %arg6[%c0_19, %c0_20], %69 {strides = array<i32>} : memref<8x10xf32, #tpu.memory_space<vmem>>, vector<8x10xf32>,
    return
  }
  func.func @transform_0(%arg0: i32) -> (i32, i32) {
    %c0_i32 = arith.constant 0 : i32
    %c0_i32_0 = arith.constant 0 : i32
    return %arg0, %c0_i32 : i32, i32
  }
  func.func @transform_1(%arg0: i32) -> (i32, i32) {
    %c0_i32 = arith.constant 0 : i32
    %c0_i32_0 = arith.constant 0 : i32
    %c0_i32_1 = arith.constant 0 : i32
    return %c0_i32, %c0_i32_0 : i32, i32
  }
  func.func @transform_2(%arg0: i32) -> (i32, i32) {
    %c0_i32 = arith.constant 0 : i32
    %c0_i32_0 = arith.constant 0 : i32
    %c0_i32_1 = arith.constant 0 : i32
    return %c0_i32, %c0_i32_0 : i32, i32
  }
  func.func @transform_3(%arg0: i32) -> (i32, i32) {
    %c0_i32 = arith.constant 0 : i32
    %c0_i32_0 = arith.constant 0 : i32
    return %arg0, %c0_i32 : i32, i32
  }
  func.func @transform_4(%arg0: i32) -> (i32, i32) {
    %c0_i32 = arith.constant 0 : i32
    %c0_i32_0 = arith.constant 0 : i32
    return %arg0, %c0_i32 : i32, i32
  }
  func.func @transform_5(%arg0: i32) -> (i32, i32) {
    %c0_i32 = arith.constant 0 : i32
    %c0_i32_0 = arith.constant 0 : i32
    return %arg0, %c0_i32 : i32, i32
  }
}

module attributes {stable_mosaic.version = 11 : i64} {
  func.func @pimodel_loss_kernel(%arg0: i32, %arg1: memref<64x32xbf16, #tpu.memory_space<vmem>>, %arg2: memref<32x10xbf16, #tpu.memory_space<vmem>>, %arg3: memref<1x10xf32, #tpu.memory_space<vmem>>, %arg4: memref<64x10xbf16, #tpu.memory_space<vmem>>, %arg5: memref<64x1xf32, #tpu.memory_space<vmem>>, %arg6: memref<8x10xf32, #tpu.memory_space<vmem>>, %arg7: memref<64x10xf32, #tpu.memory_space<vmem>>) attributes {dimension_semantics = [#tpu.dimension_semantics<parallel>], iteration_bounds = array<i64: 1>, scalar_prefetch = 0 : i64, scratch_operands = 1 : i64, tpu.core_type = #tpu.core_type<tc>, window_params = [{transform_indices = @transform_0, window_bounds = array<i64: 64, 32>}, {pipeline_mode = #tpu.pipeline_mode<synchronous>, transform_indices = @transform_1, window_bounds = array<i64: 32, 10>}, {pipeline_mode = #tpu.pipeline_mode<synchronous>, transform_indices = @transform_2, window_bounds = array<i64: 1, 10>}, {transform_indices = @transform_3, window_bounds = array<i64: 64, 10>}, {transform_indices = @transform_4, window_bounds = array<i64: 64, 1>}, {transform_indices = @transform_5, window_bounds = array<i64: 8, 10>}]} {
    %c0 = arith.constant 0 : index
    %c0_0 = arith.constant 0 : index
    %0 = vector.load %arg1[%c0, %c0_0] : memref<64x32xbf16, #tpu.memory_space<vmem>>, vector<64x32xbf16>
    %c0_1 = arith.constant 0 : index
    %c0_2 = arith.constant 0 : index
    %1 = vector.load %arg2[%c0_1, %c0_2] : memref<32x10xbf16, #tpu.memory_space<vmem>>, vector<32x10xbf16>
    %cst = arith.constant dense<0.000000e+00> : vector<64x10xf32>
    %2 = tpu.matmul %0, %1, %cst {dimension_numbers = #tpu.dot_dimension_numbers<[1], [0], [0], [1], [0, 0, 1, 1], [], []>} : vector<64x32xbf16>, vector<32x10xbf16>, vector<64x10xf32> -> vector<64x10xf32>
    %c0_3 = arith.constant 0 : index
    %c0_4 = arith.constant 0 : index
    %3 = vector.load %arg3[%c0_3, %c0_4] : memref<1x10xf32, #tpu.memory_space<vmem>>, vector<1x10xf32>
    %4 = vector.broadcast %3 : vector<1x10xf32> to vector<64x10xf32>
    %5 = arith.addf %2, %4 : vector<64x10xf32>
    %c0_5 = arith.constant 0 : index
    %c0_6 = arith.constant 0 : index
    %6 = vector.load %arg7[%c0_5, %c0_6] : memref<64x10xf32, #tpu.memory_space<vmem>>, vector<64x10xf32>
    tpu.vector_store %arg7[%c0_5, %c0_6], %5 {strides = array<i32>} : memref<64x10xf32, #tpu.memory_space<vmem>>, vector<64x10xf32>,
    %cst_7 = arith.constant 0.000000e+00 : f32
    %7 = vector.broadcast %cst_7 : f32 to vector<8x10xf32>
    %c0_i32 = arith.constant 0 : i32
    %c32_i32 = arith.constant 32 : i32
    %8 = arith.muli %c0_i32, %c32_i32 : i32
    %9 = tpu.assume_multiple %8, 32 : i32
    %10 = arith.index_cast %9 : i32 to index
    %c0_8 = arith.constant 0 : index
    %11 = vector.load %arg7[%10, %c0_8] : memref<64x10xf32, #tpu.memory_space<vmem>>, vector<32x10xf32>
    %cst_9 = arith.constant dense<0xFF800000> : vector<32xf32>
    %12 = vector.multi_reduction <maximumf>, %11, %cst_9 [1] : vector<32x10xf32> to vector<32xf32>
    %13 = vector.shape_cast %12 : vector<32xf32> to vector<32x1xf32>
    %14 = vector.broadcast %13 : vector<32x1xf32> to vector<32x10xf32>
    %15 = arith.subf %11, %14 : vector<32x10xf32>
    %16 = math.exp %15 : vector<32x10xf32>
    %cst_10 = arith.constant dense<0.000000e+00> : vector<32xf32>
    %17 = vector.multi_reduction <add>, %16, %cst_10 [1] : vector<32x10xf32> to vector<32xf32>
    %18 = vector.shape_cast %17 : vector<32xf32> to vector<32x1xf32>
    %19 = tpu.reciprocal %18 {approx = true} : vector<32x1xf32> -> vector<32x1xf32>
    %20 = vector.broadcast %19 : vector<32x1xf32> to vector<32x10xf32>
    %21 = arith.mulf %16, %20 : vector<32x10xf32>
    %22 = arith.index_cast %9 : i32 to index
    %c0_11 = arith.constant 0 : index
    %23 = vector.load %arg4[%22, %c0_11] : memref<64x10xbf16, #tpu.memory_space<vmem>>, vector<32x10xbf16>
    %24 = arith.extf %23 : vector<32x10xbf16> to vector<32x10xf32>
    %25 = arith.subf %21, %24 : vector<32x10xf32>
    %26 = arith.mulf %25, %25 : vector<32x10xf32>
    %27 = arith.index_cast %9 : i32 to index
    %c0_12 = arith.constant 0 : index
    %28 = vector.load %arg5[%27, %c0_12] : memref<64x1xf32, #tpu.memory_space<vmem>>, vector<32x1xf32>
    %29 = vector.broadcast %28 : vector<32x1xf32> to vector<32x10xf32>
    %30 = arith.mulf %26, %29 : vector<32x10xf32>
    %31 = vector.extract_strided_slice %30 {offsets = [0, 0], sizes = [8, 10], strides = [1, 1]} : vector<32x10xf32> to vector<8x10xf32>
    %32 = vector.extract_strided_slice %30 {offsets = [8, 0], sizes = [8, 10], strides = [1, 1]} : vector<32x10xf32> to vector<8x10xf32>
    %33 = arith.addf %31, %32 : vector<8x10xf32>
    %34 = vector.extract_strided_slice %30 {offsets = [16, 0], sizes = [8, 10], strides = [1, 1]} : vector<32x10xf32> to vector<8x10xf32>
    %35 = arith.addf %33, %34 : vector<8x10xf32>
    %36 = vector.extract_strided_slice %30 {offsets = [24, 0], sizes = [8, 10], strides = [1, 1]} : vector<32x10xf32> to vector<8x10xf32>
    %37 = arith.addf %35, %36 : vector<8x10xf32>
    %38 = arith.addf %7, %37 : vector<8x10xf32>
    %c1_i32 = arith.constant 1 : i32
    %c32_i32_13 = arith.constant 32 : i32
    %39 = arith.muli %c1_i32, %c32_i32_13 : i32
    %40 = tpu.assume_multiple %39, 32 : i32
    %41 = arith.index_cast %40 : i32 to index
    %c0_14 = arith.constant 0 : index
    %42 = vector.load %arg7[%41, %c0_14] : memref<64x10xf32, #tpu.memory_space<vmem>>, vector<32x10xf32>
    %cst_15 = arith.constant dense<0xFF800000> : vector<32xf32>
    %43 = vector.multi_reduction <maximumf>, %42, %cst_15 [1] : vector<32x10xf32> to vector<32xf32>
    %44 = vector.shape_cast %43 : vector<32xf32> to vector<32x1xf32>
    %45 = vector.broadcast %44 : vector<32x1xf32> to vector<32x10xf32>
    %46 = arith.subf %42, %45 : vector<32x10xf32>
    %47 = math.exp %46 : vector<32x10xf32>
    %cst_16 = arith.constant dense<0.000000e+00> : vector<32xf32>
    %48 = vector.multi_reduction <add>, %47, %cst_16 [1] : vector<32x10xf32> to vector<32xf32>
    %49 = vector.shape_cast %48 : vector<32xf32> to vector<32x1xf32>
    %50 = tpu.reciprocal %49 {approx = true} : vector<32x1xf32> -> vector<32x1xf32>
    %51 = vector.broadcast %50 : vector<32x1xf32> to vector<32x10xf32>
    %52 = arith.mulf %47, %51 : vector<32x10xf32>
    %53 = arith.index_cast %40 : i32 to index
    %c0_17 = arith.constant 0 : index
    %54 = vector.load %arg4[%53, %c0_17] : memref<64x10xbf16, #tpu.memory_space<vmem>>, vector<32x10xbf16>
    %55 = arith.extf %54 : vector<32x10xbf16> to vector<32x10xf32>
    %56 = arith.subf %52, %55 : vector<32x10xf32>
    %57 = arith.mulf %56, %56 : vector<32x10xf32>
    %58 = arith.index_cast %40 : i32 to index
    %c0_18 = arith.constant 0 : index
    %59 = vector.load %arg5[%58, %c0_18] : memref<64x1xf32, #tpu.memory_space<vmem>>, vector<32x1xf32>
    %60 = vector.broadcast %59 : vector<32x1xf32> to vector<32x10xf32>
    %61 = arith.mulf %57, %60 : vector<32x10xf32>
    %62 = vector.extract_strided_slice %61 {offsets = [0, 0], sizes = [8, 10], strides = [1, 1]} : vector<32x10xf32> to vector<8x10xf32>
    %63 = vector.extract_strided_slice %61 {offsets = [8, 0], sizes = [8, 10], strides = [1, 1]} : vector<32x10xf32> to vector<8x10xf32>
    %64 = arith.addf %62, %63 : vector<8x10xf32>
    %65 = vector.extract_strided_slice %61 {offsets = [16, 0], sizes = [8, 10], strides = [1, 1]} : vector<32x10xf32> to vector<8x10xf32>
    %66 = arith.addf %64, %65 : vector<8x10xf32>
    %67 = vector.extract_strided_slice %61 {offsets = [24, 0], sizes = [8, 10], strides = [1, 1]} : vector<32x10xf32> to vector<8x10xf32>
    %68 = arith.addf %66, %67 : vector<8x10xf32>
    %69 = arith.addf %38, %68 : vector<8x10xf32>
    %c2_i32 = arith.constant 2 : i32
    %c0_19 = arith.constant 0 : index
    %c0_20 = arith.constant 0 : index
    %70 = vector.load %arg6[%c0_19, %c0_20] : memref<8x10xf32, #tpu.memory_space<vmem>>, vector<8x10xf32>
    tpu.vector_store %arg6[%c0_19, %c0_20], %69 {strides = array<i32>} : memref<8x10xf32, #tpu.memory_space<vmem>>, vector<8x10xf32>,
    return
  }
  func.func @transform_0(%arg0: i32) -> (i32, i32) {
    %c0_i32 = arith.constant 0 : i32
    %c0_i32_0 = arith.constant 0 : i32
    return %arg0, %c0_i32 : i32, i32
  }
  func.func @transform_1(%arg0: i32) -> (i32, i32) {
    %c0_i32 = arith.constant 0 : i32
    %c0_i32_0 = arith.constant 0 : i32
    %c0_i32_1 = arith.constant 0 : i32
    return %c0_i32, %c0_i32_0 : i32, i32
  }
  func.func @transform_2(%arg0: i32) -> (i32, i32) {
    %c0_i32 = arith.constant 0 : i32
    %c0_i32_0 = arith.constant 0 : i32
    %c0_i32_1 = arith.constant 0 : i32
    return %c0_i32, %c0_i32_0 : i32, i32
  }
  func.func @transform_3(%arg0: i32) -> (i32, i32) {
    %c0_i32 = arith.constant 0 : i32
    %c0_i32_0 = arith.constant 0 : i32
    return %arg0, %c0_i32 : i32, i32
  }
  func.func @transform_4(%arg0: i32) -> (i32, i32) {
    %c0_i32 = arith.constant 0 : i32
    %c0_i32_0 = arith.constant 0 : i32
    return %arg0, %c0_i32 : i32, i32
  }
  func.func @transform_5(%arg0: i32) -> (i32, i32) {
    %c0_i32 = arith.constant 0 : i32
    %c0_i32_0 = arith.constant 0 : i32
    return %arg0, %c0_i32 : i32, i32
  }
}

</mosaic_0001>

<bundles_post_ra>
// kernel: tpu_custom_call.1
= control target key start
LH: loop header
LB: loop body
LE: loop exit
PB: predicated region body
PF: predicated region fallthrough
CT: control target
= control target key end

     0   :  { %vm73_vm0 = vcmask 261120   ;;  %s673_s0 = inlined_call_operand.vmem [shape: bf16[64,32], index: 0, kind: input, shape index: {}]   ;;  %s674_s1 = inlined_call_operand.vmem [shape: bf16[32,10], index: 1, kind: input, shape index: {}]   ;;  %s675_s2 = inlined_call_operand.vmem [shape: f32[1,10], index: 2, kind: input, shape index: {}]   ;;  %s676_s3 = inlined_call_operand.vmem [shape: bf16[64,10], index: 3, kind: input, shape index: {}]   ;;  %s677_s4 = inlined_call_operand.vmem [shape: f32[64,1], index: 4, kind: input, shape index: {}]   ;;  %s678_s5 = inlined_call_operand.hbm [shape: f32[8,10], index: 5, kind: output, shape index: {}]  }
   0x1   :  { %v434_v0 = vld [vmem:[%s674_s1] sm:$0xff]   ;;  %v435_v1 = vld [vmem:[%s674_s1 + $0x8] sm:$0xff]   ;;  %v437_v3 = vld [vmem:[%s673_s0 + $0x10] sm:$0xff]  }
   0x2   :  { %414 = vmatprep.subr.bf16.mxu0 %v434_v0  ;;  %426 = vmatprep.subr.bf16.mxu1 %v434_v0  ;;  %v436_v2 = vld [vmem:[%s673_s0] sm:$0xff]   ;;  %v438_v4 = vld [vmem:[%s673_s0 + $0x8] sm:$0xff]   ;;  %v439_v5 = vld [vmem:[%s673_s0 + $0x18] sm:$0xff]  }
   0x3   :  { %415 = vmatpush3.bf16.msra.mxu0 %v434_v0  ;;  %428 = vmatpush3.bf16.msra.mxu1 %v434_v0 }
   0x4   :  { %416 = vmatprep.subr.bf16.mxu0 %v435_v1  ;;  %427 = vmatprep.subr.bf16.mxu1 %v435_v1 }
   0x5   :  { %418 = vmatprep.mubr.msk.bf16.mxu0 %vm73_vm0, %v436_v2  ;;  %422 = vmatprep.mubr.msk.bf16.mxu1 %vm73_vm0, %v437_v3 }
   0x6   :  { %10 = vsyncpa [#allocation4], 0  ;;  %v370_v6 = vld [vmem:[%s675_s2] ss:$0 sm:$0xff]  ;;  %vm151_vm1 = vcmask 80896   ;;  %v496_v39 = vmov 0  }
   0x7   :  { %417 = vmatpush3.bf16.msra.mxu0 %v435_v1  ;;  %429 = vmatpush3.bf16.msra.mxu1 %v435_v1  ;;  %v225_v2 = vld [vmem:[%s677_s4 + $0x8] sm:$0xff]  ;;  %v385_v3 = vld [vmem:[%s677_s4 + $0x20] sm:$0xff] }
   0x8   :  { %433 = vset.pattern.permute.xlu1 %v496_v39  ;;  %432 = vset.pattern.permute.xlu0 %v496_v39 }
   0xa   :  { %419 = vmatmul.mubr.msk.bf16.vlgmr.msra.gmra.mrb[0].mxu0 %vm73_vm0, %v438_v4  ;;  %423 = vmatmul.mubr.msk.bf16.vlgmr.msra.gmra.mrb[0].mxu1 %vm73_vm0, %v439_v5  ;;  %v386_v4 = vld [vmem:[%s677_s4 + $0x28] sm:$0xff]  ;;  %v226_v5 = vld [vmem:[%s677_s4 + $0x10] sm:$0xff] }
  0xdd   :  { %v420_v7 = vpop.f32.mrb[0].mxu0  ;;  %v424_v8 = vpop.f32.mrb[0].mxu1 }
  0xde   :  { %v129_v9 = vadd.f32 %v420_v7, %v370_v6  ;;  %v145_v10 = vadd.f32 %v424_v8, %v370_v6  ;;  %v136_v11 = vpop.f32.mrb[1].mxu1  ;;  %v120_v12 = vpop.f32.mrb[1].mxu0  ;;  %v224_v7 = vld [vmem:[%s677_s4] sm:$0xff]  ;;  %v227_v8 = vld [vmem:[%s677_s4 + $0x18] sm:$0xff] }
  0xdf   :  { %v137_v13 = vadd.f32 %v370_v6, %v136_v11  ;;  %v425_v14 = vpop.f32.mrb[2].mxu1  ;;  %v121_v15 = vadd.f32 %v370_v6, %v120_v12  ;;  %v421_v16 = vpop.f32.mrb[2].mxu0 }
  0xe0   :  { %154 = vst.msk [vmem:[#allocation2 + $0x10] sm:$0xff] %vm151_vm1, %v129_v9  ;;  %158 = vst.msk [vmem:[#allocation2 + $0x30] sm:$0xff] %vm151_vm1, %v145_v10  ;;  %v148_v17 = vadd.f32 %v425_v14, %v370_v6  ;;  %v139_v18 = vpop.f32.mrb[3].mxu1  ;;  %v132_v19 = vadd.f32 %v421_v16, %v370_v6  ;;  %v123_v20 = vpop.f32.mrb[3].mxu0 }
  0xe1   :  { %156 = vst.msk [vmem:[#allocation2 + $0x20] sm:$0xff] %vm151_vm1, %v137_v13  ;;  %v140_v21 = vadd.f32 %v370_v6, %v139_v18  ;;  %152 = vst.msk [vmem:[#allocation2] sm:$0xff] %vm151_vm1, %v121_v15  ;;  %v124_v22 = vadd.f32 %v370_v6, %v123_v20  ;;  %v387_v6 = vld [vmem:[%s677_s4 + $0x30] sm:$0xff] }
  0xe2   :  { %159 = vst.msk [vmem:[#allocation2 + $0x38] sm:$0xff] %vm151_vm1, %v148_v17  ;;  %155 = vst.msk [vmem:[#allocation2 + $0x18] sm:$0xff] %vm151_vm1, %v132_v19 }
  0xe3   :  { %157 = vst.msk [vmem:[#allocation2 + $0x28] sm:$0xff] %vm151_vm1, %v140_v21  ;;  %153 = vst.msk [vmem:[#allocation2 + $0x8] sm:$0xff] %vm151_vm1, %v124_v22 }
  0xe7   :  { %v259_v23 = vld [vmem:[#allocation2 + $0x30] sm:$0xff] }
  0xe8   :  { %v162_v24 = vld [vmem:[#allocation2 + $0x10] sm:$0xff]  ;;  %v267_v25 = vsel %vm151_vm1, %v259_v23, -inf  ;;  %v160_v27 = vld [vmem:[#allocation2] sm:$0xff] }
  0xe9   :  { %v170_v26 = vsel %vm151_vm1, %v162_v24, -inf  ;;  %268 = vmax.xlane.f32.xlu1 %v267_v25  ;;  %v257_v28 = vld [vmem:[#allocation2 + $0x20] sm:$0xff]  ;;  %v164_v29 = vsel %vm151_vm1, %v160_v27, -inf  ;;  %v563_v32 = vld [vmem:[#allocation2 + $0x38] sm:$0xff] }
  0xea   :  { %171 = vmax.xlane.f32.xlu0 %v170_v26  ;;  %v560_v30 = vld [vmem:[#allocation2 + $0x8] sm:$0xff]  ;;  %v261_v31 = vsel %vm151_vm1, %v257_v28, -inf  ;;  %v163_v34 = vld [vmem:[#allocation2 + $0x18] sm:$0xff]  ;;  %v270_v35 = vsel %vm151_vm1, %v563_v32, -inf }
  0xeb   :  { %v167_v33 = vsel %vm151_vm1, %v560_v30, -inf  ;;  %v569_v36 = vld [vmem:[#allocation2 + $0x28] sm:$0xff]  ;;  %v173_v37 = vsel %vm151_vm1, %v163_v34, -inf }
  0xec   :  { %v264_v38 = vsel %vm151_vm1, %v569_v36, -inf }
  0xed   :  { %262 = vmax.xlane.f32.xlu1 %v261_v31 }
  0xee   :  { %165 = vmax.xlane.f32.xlu0 %v164_v29 }
  0xf1   :  { %271 = vmax.xlane.f32.xlu1 %v270_v35 }
  0xf2   :  { %168 = vmax.xlane.f32.xlu0 %v167_v33 }
  0xf5   :  { %265 = vmax.xlane.f32.xlu1 %v264_v38  ;;  %v390_v38 = vld [vmem:[%s676_s3] sm:$0xff]  }
  0xf6   :  { %174 = vmax.xlane.f32.xlu0 %v173_v37 }
 0x176   :  { %v269_v40 = vpop.xlane.xlu1 %268 }
 0x177   :  { %v172_v41 = vpop.xlane.xlu0 %171  ;;  %v275_v42 = vsub.f32 %v259_v23, %v269_v40  ;;  %v388_v23 = vld [vmem:[%s677_s4 + $0x38] sm:$0xff] }
 0x178   :  { %v178_v43 = vsub.f32 %v162_v24, %v172_v41  ;;  %v405_v41 = vld [vmem:[%s676_s3 + $0x8] sm:$0xff]  }
 0x179   :  { %v281_v44 = vmul.f32 1.442695, %v275_v42 }
 0x17a   :  { %v184_v45 = vmul.f32 1.442695, %v178_v43  ;;  %v263_v46 = vpop.xlane.xlu1 %262  ;;  %v391_v43 = vunpack.c.l.bf16 %v390_v38 }
 0x17b   :  { %v166_v47 = vpop.xlane.xlu0 %165  ;;  %440 = vpow2.f32 %v281_v44  ;;  %v273_v48 = vsub.f32 %v257_v28, %v263_v46 }
 0x17c   :  { %v176_v49 = vsub.f32 %v160_v27, %v166_v47  ;;  %442 = vpow2.f32 %v184_v45  ;;  %v406_v45 = vld [vmem:[%s676_s3 + $0x10] sm:$0xff]   ;;  %v395_v47 = vunpack.c.l.bf16 %v405_v41 }
 0x17d   :  { %v277_v51 = vmul.f32 1.442695, %v273_v48 }
 0x17e   :  { %v180_v50 = vmul.f32 1.442695, %v176_v49  ;;  %v272_v9 = vpop.xlane.xlu1 %271 }
 0x17f   :  { %v169_v52 = vpop.xlane.xlu0 %168  ;;  %v276_v10 = vsub.f32 %v563_v32, %v272_v9 }
 0x180   :  { %444 = vpow2.f32 %v180_v50  ;;  %v177_v12 = vsub.f32 %v560_v30, %v169_v52 }
 0x181   :  { %446 = vpow2.f32 %v277_v51  ;;  %v283_v11 = vmul.f32 1.442695, %v276_v10  ;;  %v407_v51 = vld [vmem:[%s676_s3 + $0x18] sm:$0xff]   ;;  %s497_s3 = smov [#allocation3]  }
 0x182   :  { %v266_v13 = vpop.xlane.xlu1 %265  ;;  %v182_v14 = vmul.f32 1.442695, %v177_v12  ;;  %s362_s27 = sshll.u32 %s497_s3, 4  ;;  %s363_s27 = int_to_ptr.vmem [resolvable:$true] %s362_s27 }
 0x183   :  { %v175_v53 = vpop.xlane.xlu0 %174  ;;  %v274_v15 = vsub.f32 %v569_v36, %v266_v13  ;;  %s472_s1 = scalar_lea.vmem %s363_s27, 128  ;;  %p477_p1 = scmp.lt.s32.totalorder %s363_s27, %s363_s27 }
 0x184   :  { %v179_v54 = vsub.f32 %v163_v34, %v175_v53  ;;  %v399_v53 = vunpack.c.l.bf16 %v406_v45  ;;  %p473_p0 = scmp.ne.s32.totalorder %s363_s27, %s472_s1  ;;  %p478_p2 = scmp.lt.s32.totalorder %s472_s1, %s472_s1 }
 0x185   :  { %v574_v55 = vpop.eup %440  ;;  %v279_v16 = vmul.f32 1.442695, %v274_v15 }
 0x186   :  { %v186_v56 = vmul.f32 1.442695, %v179_v54  ;;  %v576_v57 = vpop.eup %442  ;;  %v291_v58 = vsel %vm151_vm1, %v574_v55, 0.0  ;;  %p479_p3 = por %p478_p2, %p477_p1 }
 0x187   :  { %292 = vadd.xlane.f32.xlu1 %v291_v58  ;;  %v194_v59 = vsel %vm151_vm1, %v576_v57, 0.0 }
 0x188   :  { %448 = vpow2.f32 %v186_v56  ;;  %195 = vadd.xlane.f32.xlu0 %v194_v59  ;;  %v392_v56 = vunpack.c.h.bf16 %v390_v38  ;;  %v403_v59 = vunpack.c.l.bf16 %v407_v51  ;;  %p480_p4 = pnand %p479_p3, %p473_p0 }
 0x189   :  { %450 = vpow2.f32 %v283_v11 }
 0x18a   :  { %v582_v60 = vpop.eup %444  ;;  %452 = vpow2.f32 %v182_v14 }
 0x18b   :  { %v188_v61 = vsel %vm151_vm1, %v582_v60, 0.0  ;;  %v586_v62 = vpop.eup %446  ;;  %454 = vpow2.f32 %v279_v16 }
 0x18c   :  { %189 = vadd.xlane.f32.xlu0 %v188_v61  ;;  %v285_v63 = vsel %vm151_vm1, %v586_v62, 0.0 }
 0x190   :  { %286 = vadd.xlane.f32.xlu0 %v285_v63  ;;  %v404_v63 = vunpack.c.h.bf16 %v407_v51 }
 0x192   :  { %v590_v0 = vpop.eup %448 }
 0x193   :  { %v197_v1 = vsel %vm151_vm1, %v590_v0, 0.0  ;;  %v618_v17 = vpop.eup %450 }
 0x194   :  { %198 = vadd.xlane.f32.xlu0 %v197_v1  ;;  %v294_v18 = vsel %vm151_vm1, %v618_v17, 0.0  ;;  %v453_v19 = vpop.eup %452 }
 0x195   :  { %v191_v20 = vsel %vm151_vm1, %v453_v19, 0.0  ;;  %v455_v21 = vpop.eup %454 }
 0x196   :  { %v288_v22 = vsel %vm151_vm1, %v455_v21, 0.0 }
 0x198   :  { %235 = vperm.xlu1 %433, %v225_v2  }
 0x19c   :  { %329 = vperm.xlu1 %433, %v385_v3  }
 0x1a0   :  { %334 = vperm.xlu1 %433, %v386_v4  }
 0x1a4   :  { %240 = vperm.xlu1 %433, %v226_v5  }
 0x1a8   :  { %339 = vperm.xlu1 %433, %v387_v6  }
 0x1aa   :  { %230 = vperm.xlu0 %432, %v224_v7   ;;  %v400_v7 = vunpack.c.h.bf16 %v406_v45 }
 0x1ac   :  { %245 = vperm.xlu1 %433, %v227_v8  }
 0x1d0   :  { %295 = vadd.xlane.f32.xlu1 %v294_v18 }
 0x1d4   :  { %192 = vadd.xlane.f32.xlu1 %v191_v20 }
 0x1d8   :  { %289 = vadd.xlane.f32.xlu1 %v288_v22 }
 0x1e9   :  { %344 = vperm.xlu1 %433, %v388_v23  }
 0x214   :  { %v293_v24 = vpop.xlane.xlu1 %292 }
 0x215   :  { %v196_v28 = vpop.xlane.xlu0 %195 }
 0x218   :  { %v627_v25 = vpop.permute.xlu1 %235 }
 0x219   :  { %v190_v30 = vpop.xlane.xlu0 %189 }
 0x21a   :  { %456 = vrcp.f32 %v190_v30 }
 0x21b   :  { %458 = vrcp.f32 %v196_v28 }
 0x21c   :  { %v629_v26 = vpop.permute.xlu1 %329 }
 0x21d   :  { %v287_v32 = vpop.xlane.xlu0 %286 }
 0x21e   :  { %460 = vrcp.f32 %v287_v32 }
 0x21f   :  { %462 = vrcp.f32 %v293_v24 }
 0x220   :  { %v631_v27 = vpop.permute.xlu1 %334 }
 0x221   :  { %v199_v34 = vpop.xlane.xlu0 %198 }
 0x222   :  { %464 = vrcp.f32 %v199_v34 }
 0x224   :  { %v241_v29 = vpop.permute.xlu1 %240  ;;  %v457_v37 = vpop.eup %456 }
 0x225   :  { %v459_v40 = vpop.eup %458  ;;  %v204_v42 = vmul.f32 %v457_v37, %v582_v60  ;;  %v396_v60 = vunpack.c.h.bf16 %v405_v41 }
 0x226   :  { %v206_v50 = vmul.f32 %v459_v40, %v576_v57 }
 0x227   :  { %v216_v52 = vsub.f32 %v204_v42, %v391_v43 }
 0x228   :  { %v633_v31 = vpop.permute.xlu1 %339  ;;  %v461_v44 = vpop.eup %460  ;;  %v218_v1 = vsub.f32 %v206_v50, %v395_v47 }
 0x229   :  { %v463_v46 = vpop.eup %462  ;;  %v301_v49 = vmul.f32 %v461_v44, %v586_v62  ;;  %v220_v3 = vmul.f32 %v216_v52, %v216_v52  ;;  %v231_v4 = vpop.permute.xlu0 %230 }
 0x22a   :  { %v303_v2 = vmul.f32 %v463_v46, %v574_v55  ;;  %v222_v11 = vmul.f32 %v218_v1, %v218_v1 }
 0x22b   :  { %v314_v62 = vsub.f32 %v301_v49, %v399_v53  ;;  %v248_v13 = vmul.f32 %v231_v4, %v220_v3 }
 0x22c   :  { %v635_v33 = vpop.permute.xlu1 %245  ;;  %v465_v48 = vpop.eup %464  ;;  %v316_v12 = vsub.f32 %v303_v2, %v403_v59  ;;  %v250_v22 = vmul.f32 %v241_v29, %v222_v11 }
 0x22d   :  { %v207_v57 = vmul.f32 %v465_v48, %v590_v0  ;;  %v318_v14 = vmul.f32 %v314_v62, %v314_v62 }
 0x22e   :  { %v320_v0 = vmul.f32 %v316_v12, %v316_v12 }
 0x22f   :  { %v219_v15 = vsub.f32 %v207_v57, %v396_v60 }
 0x230   :  { %v349_v28 = vmul.f32 %v633_v31, %v320_v0 }
 0x231   :  { %v223_v23 = vmul.f32 %v219_v15, %v219_v15 }
 0x25d   :  { %v296_v35 = vpop.xlane.xlu1 %295 }
 0x25e   :  { %466 = vrcp.f32 %v296_v35  ;;  %v251_v35 = vmul.f32 %v635_v33, %v223_v23 }
 0x261   :  { %v193_v36 = vpop.xlane.xlu1 %192 }
 0x262   :  { %468 = vrcp.f32 %v193_v36 }
 0x265   :  { %v290_v39 = vpop.xlane.xlu1 %289 }
 0x266   :  { %470 = vrcp.f32 %v290_v39 }
 0x268   :  { %v467_v54 = vpop.eup %466 }
 0x269   :  { %v304_v6 = vmul.f32 %v467_v54, %v618_v17  ;;  %v345_v34 = vpop.permute.xlu1 %344 }
 0x26b   :  { %v317_v18 = vsub.f32 %v304_v6, %v404_v63 }
 0x26c   :  { %v469_v58 = vpop.eup %468 }
 0x26d   :  { %v205_v61 = vmul.f32 %v469_v58, %v453_v19  ;;  %v321_v24 = vmul.f32 %v317_v18, %v317_v18 }
 0x26f   :  { %v217_v5 = vsub.f32 %v205_v61, %v392_v56  ;;  %v350_v36 = vmul.f32 %v345_v34, %v321_v24 }
 0x270   :  { %v471_v8 = vpop.eup %470 }
 0x271   :  { %v302_v9 = vmul.f32 %v471_v8, %v455_v21  ;;  %v221_v10 = vmul.f32 %v217_v5, %v217_v5  ;;  %v347_v21 = vmul.f32 %v629_v26, %v318_v14 }
 0x273   :  { %v315_v16 = vsub.f32 %v302_v9, %v400_v7  ;;  %v249_v55 = vmul.f32 %v627_v25, %v221_v10 }
 0x275   :  { %v319_v19 = vmul.f32 %v315_v16, %v315_v16  ;;  %v252_v20 = vadd.f32 %v249_v55, %v248_v13 }
 0x277   :  { %v348_v17 = vmul.f32 %v631_v27, %v319_v19  ;;  %v253_v32 = vadd.f32 %v252_v20, %v250_v22 }
 0x279   :  { %v351_v30 = vadd.f32 %v348_v17, %v347_v21  ;;  %v254_v29 = vadd.f32 %v253_v32, %v251_v35 }
 0x27b   :  { %v352_v37 = vadd.f32 %v351_v30, %v349_v28 }
 0x27d   :  { %v353_v25 = vadd.f32 %v352_v37, %v350_v36 }
 0x27f   :  { %v354_v38 = vadd.f32 %v353_v25, %v254_v29 }
 0x281   :  { %355 = vst.msk [vmem:[#allocation3] sm:$0xff] %vm151_vm1, %v354_v38 }
 0x282   :  { %483 = shalt.err (!%p480_p4)
}
 0x283   :  { %s484_s30 = scalar_lea.hbm %s678_s5, 128 }
 0x284   :  { %p485_p5 = scmp.ne.s32.totalorder %s678_s5, %s484_s30  ;;  %p488_p6 = scmp.lt.u32.totalorder %s484_s30, %s678_s5 }
 0x286   :  { %p490_p7 = pnand %p488_p6, %p485_p5 }
 0x288   :  { %493 = shalt.err (!%p490_p7)
}
 0x289   :  { %365 = dma.vmem_to_hbm [thread:$0]  %s363_s27, 128, %s678_s5, [#allocation4]  }
 0x28a   :  { %494 = dma.done.wait [#allocation4], 128  }
 0x28b   :  { %495 = vsyncadd [#allocation4], 4294967168 }
 0x28c   :  { %369 = vsyncpa [#allocation4], 1 }

// kernel: tpu_custom_call.1
= control target key start
LH: loop header
LB: loop body
LE: loop exit
PB: predicated region body
PF: predicated region fallthrough
CT: control target
= control target key end

     0   :  { %vm73_vm0 = vcmask 261120   ;;  %s673_s0 = inlined_call_operand.vmem [shape: bf16[64,32], index: 0, kind: input, shape index: {}]   ;;  %s674_s1 = inlined_call_operand.vmem [shape: bf16[32,10], index: 1, kind: input, shape index: {}]   ;;  %s675_s2 = inlined_call_operand.vmem [shape: f32[1,10], index: 2, kind: input, shape index: {}]   ;;  %s676_s3 = inlined_call_operand.vmem [shape: bf16[64,10], index: 3, kind: input, shape index: {}]   ;;  %s677_s4 = inlined_call_operand.vmem [shape: f32[64,1], index: 4, kind: input, shape index: {}]   ;;  %s678_s5 = inlined_call_operand.hbm [shape: f32[8,10], index: 5, kind: output, shape index: {}]  }
   0x1   :  { %v434_v0 = vld [vmem:[%s674_s1] sm:$0xff]   ;;  %v435_v1 = vld [vmem:[%s674_s1 + $0x8] sm:$0xff]   ;;  %v437_v3 = vld [vmem:[%s673_s0 + $0x10] sm:$0xff]  }
   0x2   :  { %414 = vmatprep.subr.bf16.mxu0 %v434_v0  ;;  %426 = vmatprep.subr.bf16.mxu1 %v434_v0  ;;  %v436_v2 = vld [vmem:[%s673_s0] sm:$0xff]   ;;  %v438_v4 = vld [vmem:[%s673_s0 + $0x8] sm:$0xff]   ;;  %v439_v5 = vld [vmem:[%s673_s0 + $0x18] sm:$0xff]  }
   0x3   :  { %415 = vmatpush3.bf16.msra.mxu0 %v434_v0  ;;  %428 = vmatpush3.bf16.msra.mxu1 %v434_v0 }
   0x4   :  { %416 = vmatprep.subr.bf16.mxu0 %v435_v1  ;;  %427 = vmatprep.subr.bf16.mxu1 %v435_v1 }
   0x5   :  { %418 = vmatprep.mubr.msk.bf16.mxu0 %vm73_vm0, %v436_v2  ;;  %422 = vmatprep.mubr.msk.bf16.mxu1 %vm73_vm0, %v437_v3 }
   0x6   :  { %10 = vsyncpa [#allocation4], 0  ;;  %v370_v6 = vld [vmem:[%s675_s2] ss:$0 sm:$0xff]  ;;  %vm151_vm1 = vcmask 80896   ;;  %v496_v39 = vmov 0  }
   0x7   :  { %417 = vmatpush3.bf16.msra.mxu0 %v435_v1  ;;  %429 = vmatpush3.bf16.msra.mxu1 %v435_v1  ;;  %v225_v2 = vld [vmem:[%s677_s4 + $0x8] sm:$0xff]  ;;  %v385_v3 = vld [vmem:[%s677_s4 + $0x20] sm:$0xff] }
   0x8   :  { %433 = vset.pattern.permute.xlu1 %v496_v39  ;;  %432 = vset.pattern.permute.xlu0 %v496_v39 }
   0xa   :  { %419 = vmatmul.mubr.msk.bf16.vlgmr.msra.gmra.mrb[0].mxu0 %vm73_vm0, %v438_v4  ;;  %423 = vmatmul.mubr.msk.bf16.vlgmr.msra.gmra.mrb[0].mxu1 %vm73_vm0, %v439_v5  ;;  %v386_v4 = vld [vmem:[%s677_s4 + $0x28] sm:$0xff]  ;;  %v226_v5 = vld [vmem:[%s677_s4 + $0x10] sm:$0xff] }
  0xdd   :  { %v420_v7 = vpop.f32.mrb[0].mxu0  ;;  %v424_v8 = vpop.f32.mrb[0].mxu1 }
  0xde   :  { %v129_v9 = vadd.f32 %v420_v7, %v370_v6  ;;  %v145_v10 = vadd.f32 %v424_v8, %v370_v6  ;;  %v136_v11 = vpop.f32.mrb[1].mxu1  ;;  %v120_v12 = vpop.f32.mrb[1].mxu0  ;;  %v224_v7 = vld [vmem:[%s677_s4] sm:$0xff]  ;;  %v227_v8 = vld [vmem:[%s677_s4 + $0x18] sm:$0xff] }
  0xdf   :  { %v137_v13 = vadd.f32 %v370_v6, %v136_v11  ;;  %v425_v14 = vpop.f32.mrb[2].mxu1  ;;  %v121_v15 = vadd.f32 %v370_v6, %v120_v12  ;;  %v421_v16 = vpop.f32.mrb[2].mxu0 }
  0xe0   :  { %154 = vst.msk [vmem:[#allocation2 + $0x10] sm:$0xff] %vm151_vm1, %v129_v9  ;;  %158 = vst.msk [vmem:[#allocation2 + $0x30] sm:$0xff] %vm151_vm1, %v145_v10  ;;  %v148_v17 = vadd.f32 %v425_v14, %v370_v6  ;;  %v139_v18 = vpop.f32.mrb[3].mxu1  ;;  %v132_v19 = vadd.f32 %v421_v16, %v370_v6  ;;  %v123_v20 = vpop.f32.mrb[3].mxu0 }
  0xe1   :  { %156 = vst.msk [vmem:[#allocation2 + $0x20] sm:$0xff] %vm151_vm1, %v137_v13  ;;  %v140_v21 = vadd.f32 %v370_v6, %v139_v18  ;;  %152 = vst.msk [vmem:[#allocation2] sm:$0xff] %vm151_vm1, %v121_v15  ;;  %v124_v22 = vadd.f32 %v370_v6, %v123_v20  ;;  %v387_v6 = vld [vmem:[%s677_s4 + $0x30] sm:$0xff] }
  0xe2   :  { %159 = vst.msk [vmem:[#allocation2 + $0x38] sm:$0xff] %vm151_vm1, %v148_v17  ;;  %155 = vst.msk [vmem:[#allocation2 + $0x18] sm:$0xff] %vm151_vm1, %v132_v19 }
  0xe3   :  { %157 = vst.msk [vmem:[#allocation2 + $0x28] sm:$0xff] %vm151_vm1, %v140_v21  ;;  %153 = vst.msk [vmem:[#allocation2 + $0x8] sm:$0xff] %vm151_vm1, %v124_v22 }
  0xe7   :  { %v259_v23 = vld [vmem:[#allocation2 + $0x30] sm:$0xff] }
  0xe8   :  { %v162_v24 = vld [vmem:[#allocation2 + $0x10] sm:$0xff]  ;;  %v267_v25 = vsel %vm151_vm1, %v259_v23, -inf  ;;  %v160_v27 = vld [vmem:[#allocation2] sm:$0xff] }
  0xe9   :  { %v170_v26 = vsel %vm151_vm1, %v162_v24, -inf  ;;  %268 = vmax.xlane.f32.xlu1 %v267_v25  ;;  %v257_v28 = vld [vmem:[#allocation2 + $0x20] sm:$0xff]  ;;  %v164_v29 = vsel %vm151_vm1, %v160_v27, -inf  ;;  %v563_v32 = vld [vmem:[#allocation2 + $0x38] sm:$0xff] }
  0xea   :  { %171 = vmax.xlane.f32.xlu0 %v170_v26  ;;  %v560_v30 = vld [vmem:[#allocation2 + $0x8] sm:$0xff]  ;;  %v261_v31 = vsel %vm151_vm1, %v257_v28, -inf  ;;  %v163_v34 = vld [vmem:[#allocation2 + $0x18] sm:$0xff]  ;;  %v270_v35 = vsel %vm151_vm1, %v563_v32, -inf }
  0xeb   :  { %v167_v33 = vsel %vm151_vm1, %v560_v30, -inf  ;;  %v569_v36 = vld [vmem:[#allocation2 + $0x28] sm:$0xff]  ;;  %v173_v37 = vsel %vm151_vm1, %v163_v34, -inf }
  0xec   :  { %v264_v38 = vsel %vm151_vm1, %v569_v36, -inf }
  0xed   :  { %262 = vmax.xlane.f32.xlu1 %v261_v31 }
  0xee   :  { %165 = vmax.xlane.f32.xlu0 %v164_v29 }
  0xf1   :  { %271 = vmax.xlane.f32.xlu1 %v270_v35 }
  0xf2   :  { %168 = vmax.xlane.f32.xlu0 %v167_v33 }
  0xf5   :  { %265 = vmax.xlane.f32.xlu1 %v264_v38  ;;  %v390_v38 = vld [vmem:[%s676_s3] sm:$0xff]  }
  0xf6   :  { %174 = vmax.xlane.f32.xlu0 %v173_v37 }
 0x176   :  { %v269_v40 = vpop.xlane.xlu1 %268 }
 0x177   :  { %v172_v41 = vpop.xlane.xlu0 %171  ;;  %v275_v42 = vsub.f32 %v259_v23, %v269_v40  ;;  %v388_v23 = vld [vmem:[%s677_s4 + $0x38] sm:$0xff] }
 0x178   :  { %v178_v43 = vsub.f32 %v162_v24, %v172_v41  ;;  %v405_v41 = vld [vmem:[%s676_s3 + $0x8] sm:$0xff]  }
 0x179   :  { %v281_v44 = vmul.f32 1.442695, %v275_v42 }
 0x17a   :  { %v184_v45 = vmul.f32 1.442695, %v178_v43  ;;  %v263_v46 = vpop.xlane.xlu1 %262  ;;  %v391_v43 = vunpack.c.l.bf16 %v390_v38 }
 0x17b   :  { %v166_v47 = vpop.xlane.xlu0 %165  ;;  %440 = vpow2.f32 %v281_v44  ;;  %v273_v48 = vsub.f32 %v257_v28, %v263_v46 }
 0x17c   :  { %v176_v49 = vsub.f32 %v160_v27, %v166_v47  ;;  %442 = vpow2.f32 %v184_v45  ;;  %v406_v45 = vld [vmem:[%s676_s3 + $0x10] sm:$0xff]   ;;  %v395_v47 = vunpack.c.l.bf16 %v405_v41 }
 0x17d   :  { %v277_v51 = vmul.f32 1.442695, %v273_v48 }
 0x17e   :  { %v180_v50 = vmul.f32 1.442695, %v176_v49  ;;  %v272_v9 = vpop.xlane.xlu1 %271 }
 0x17f   :  { %v169_v52 = vpop.xlane.xlu0 %168  ;;  %v276_v10 = vsub.f32 %v563_v32, %v272_v9 }
 0x180   :  { %444 = vpow2.f32 %v180_v50  ;;  %v177_v12 = vsub.f32 %v560_v30, %v169_v52 }
 0x181   :  { %446 = vpow2.f32 %v277_v51  ;;  %v283_v11 = vmul.f32 1.442695, %v276_v10  ;;  %v407_v51 = vld [vmem:[%s676_s3 + $0x18] sm:$0xff]   ;;  %s497_s3 = smov [#allocation3]  }
 0x182   :  { %v266_v13 = vpop.xlane.xlu1 %265  ;;  %v182_v14 = vmul.f32 1.442695, %v177_v12  ;;  %s362_s27 = sshll.u32 %s497_s3, 4  ;;  %s363_s27 = int_to_ptr.vmem [resolvable:$true] %s362_s27 }
 0x183   :  { %v175_v53 = vpop.xlane.xlu0 %174  ;;  %v274_v15 = vsub.f32 %v569_v36, %v266_v13  ;;  %s472_s1 = scalar_lea.vmem %s363_s27, 128  ;;  %p477_p1 = scmp.lt.s32.totalorder %s363_s27, %s363_s27 }
 0x184   :  { %v179_v54 = vsub.f32 %v163_v34, %v175_v53  ;;  %v399_v53 = vunpack.c.l.bf16 %v406_v45  ;;  %p473_p0 = scmp.ne.s32.totalorder %s363_s27, %s472_s1  ;;  %p478_p2 = scmp.lt.s32.totalorder %s472_s1, %s472_s1 }
 0x185   :  { %v574_v55 = vpop.eup %440  ;;  %v279_v16 = vmul.f32 1.442695, %v274_v15 }
 0x186   :  { %v186_v56 = vmul.f32 1.442695, %v179_v54  ;;  %v576_v57 = vpop.eup %442  ;;  %v291_v58 = vsel %vm151_vm1, %v574_v55, 0.0  ;;  %p479_p3 = por %p478_p2, %p477_p1 }
 0x187   :  { %292 = vadd.xlane.f32.xlu1 %v291_v58  ;;  %v194_v59 = vsel %vm151_vm1, %v576_v57, 0.0 }
 0x188   :  { %448 = vpow2.f32 %v186_v56  ;;  %195 = vadd.xlane.f32.xlu0 %v194_v59  ;;  %v392_v56 = vunpack.c.h.bf16 %v390_v38  ;;  %v403_v59 = vunpack.c.l.bf16 %v407_v51  ;;  %p480_p4 = pnand %p479_p3, %p473_p0 }
 0x189   :  { %450 = vpow2.f32 %v283_v11 }
 0x18a   :  { %v582_v60 = vpop.eup %444  ;;  %452 = vpow2.f32 %v182_v14 }
 0x18b   :  { %v188_v61 = vsel %vm151_vm1, %v582_v60, 0.0  ;;  %v586_v62 = vpop.eup %446  ;;  %454 = vpow2.f32 %v279_v16 }
 0x18c   :  { %189 = vadd.xlane.f32.xlu0 %v188_v61  ;;  %v285_v63 = vsel %vm151_vm1, %v586_v62, 0.0 }
 0x190   :  { %286 = vadd.xlane.f32.xlu0 %v285_v63  ;;  %v404_v63 = vunpack.c.h.bf16 %v407_v51 }
 0x192   :  { %v590_v0 = vpop.eup %448 }
 0x193   :  { %v197_v1 = vsel %vm151_vm1, %v590_v0, 0.0  ;;  %v618_v17 = vpop.eup %450 }
 0x194   :  { %198 = vadd.xlane.f32.xlu0 %v197_v1  ;;  %v294_v18 = vsel %vm151_vm1, %v618_v17, 0.0  ;;  %v453_v19 = vpop.eup %452 }
 0x195   :  { %v191_v20 = vsel %vm151_vm1, %v453_v19, 0.0  ;;  %v455_v21 = vpop.eup %454 }
 0x196   :  { %v288_v22 = vsel %vm151_vm1, %v455_v21, 0.0 }
 0x198   :  { %235 = vperm.xlu1 %433, %v225_v2  }
 0x19c   :  { %329 = vperm.xlu1 %433, %v385_v3  }
 0x1a0   :  { %334 = vperm.xlu1 %433, %v386_v4  }
 0x1a4   :  { %240 = vperm.xlu1 %433, %v226_v5  }
 0x1a8   :  { %339 = vperm.xlu1 %433, %v387_v6  }
 0x1aa   :  { %230 = vperm.xlu0 %432, %v224_v7   ;;  %v400_v7 = vunpack.c.h.bf16 %v406_v45 }
 0x1ac   :  { %245 = vperm.xlu1 %433, %v227_v8  }
 0x1d0   :  { %295 = vadd.xlane.f32.xlu1 %v294_v18 }
 0x1d4   :  { %192 = vadd.xlane.f32.xlu1 %v191_v20 }
 0x1d8   :  { %289 = vadd.xlane.f32.xlu1 %v288_v22 }
 0x1e9   :  { %344 = vperm.xlu1 %433, %v388_v23  }
 0x214   :  { %v293_v24 = vpop.xlane.xlu1 %292 }
 0x215   :  { %v196_v28 = vpop.xlane.xlu0 %195 }
 0x218   :  { %v627_v25 = vpop.permute.xlu1 %235 }
 0x219   :  { %v190_v30 = vpop.xlane.xlu0 %189 }
 0x21a   :  { %456 = vrcp.f32 %v190_v30 }
 0x21b   :  { %458 = vrcp.f32 %v196_v28 }
 0x21c   :  { %v629_v26 = vpop.permute.xlu1 %329 }
 0x21d   :  { %v287_v32 = vpop.xlane.xlu0 %286 }
 0x21e   :  { %460 = vrcp.f32 %v287_v32 }
 0x21f   :  { %462 = vrcp.f32 %v293_v24 }
 0x220   :  { %v631_v27 = vpop.permute.xlu1 %334 }
 0x221   :  { %v199_v34 = vpop.xlane.xlu0 %198 }
 0x222   :  { %464 = vrcp.f32 %v199_v34 }
 0x224   :  { %v241_v29 = vpop.permute.xlu1 %240  ;;  %v457_v37 = vpop.eup %456 }
 0x225   :  { %v459_v40 = vpop.eup %458  ;;  %v204_v42 = vmul.f32 %v457_v37, %v582_v60  ;;  %v396_v60 = vunpack.c.h.bf16 %v405_v41 }
 0x226   :  { %v206_v50 = vmul.f32 %v459_v40, %v576_v57 }
 0x227   :  { %v216_v52 = vsub.f32 %v204_v42, %v391_v43 }
 0x228   :  { %v633_v31 = vpop.permute.xlu1 %339  ;;  %v461_v44 = vpop.eup %460  ;;  %v218_v1 = vsub.f32 %v206_v50, %v395_v47 }
 0x229   :  { %v463_v46 = vpop.eup %462  ;;  %v301_v49 = vmul.f32 %v461_v44, %v586_v62  ;;  %v220_v3 = vmul.f32 %v216_v52, %v216_v52  ;;  %v231_v4 = vpop.permute.xlu0 %230 }
 0x22a   :  { %v303_v2 = vmul.f32 %v463_v46, %v574_v55  ;;  %v222_v11 = vmul.f32 %v218_v1, %v218_v1 }
 0x22b   :  { %v314_v62 = vsub.f32 %v301_v49, %v399_v53  ;;  %v248_v13 = vmul.f32 %v231_v4, %v220_v3 }
 0x22c   :  { %v635_v33 = vpop.permute.xlu1 %245  ;;  %v465_v48 = vpop.eup %464  ;;  %v316_v12 = vsub.f32 %v303_v2, %v403_v59  ;;  %v250_v22 = vmul.f32 %v241_v29, %v222_v11 }
 0x22d   :  { %v207_v57 = vmul.f32 %v465_v48, %v590_v0  ;;  %v318_v14 = vmul.f32 %v314_v62, %v314_v62 }
 0x22e   :  { %v320_v0 = vmul.f32 %v316_v12, %v316_v12 }
 0x22f   :  { %v219_v15 = vsub.f32 %v207_v57, %v396_v60 }
 0x230   :  { %v349_v28 = vmul.f32 %v633_v31, %v320_v0 }
 0x231   :  { %v223_v23 = vmul.f32 %v219_v15, %v219_v15 }
 0x25d   :  { %v296_v35 = vpop.xlane.xlu1 %295 }
 0x25e   :  { %466 = vrcp.f32 %v296_v35  ;;  %v251_v35 = vmul.f32 %v635_v33, %v223_v23 }
 0x261   :  { %v193_v36 = vpop.xlane.xlu1 %192 }
 0x262   :  { %468 = vrcp.f32 %v193_v36 }
 0x265   :  { %v290_v39 = vpop.xlane.xlu1 %289 }
 0x266   :  { %470 = vrcp.f32 %v290_v39 }
 0x268   :  { %v467_v54 = vpop.eup %466 }
 0x269   :  { %v304_v6 = vmul.f32 %v467_v54, %v618_v17  ;;  %v345_v34 = vpop.permute.xlu1 %344 }
 0x26b   :  { %v317_v18 = vsub.f32 %v304_v6, %v404_v63 }
 0x26c   :  { %v469_v58 = vpop.eup %468 }
 0x26d   :  { %v205_v61 = vmul.f32 %v469_v58, %v453_v19  ;;  %v321_v24 = vmul.f32 %v317_v18, %v317_v18 }
 0x26f   :  { %v217_v5 = vsub.f32 %v205_v61, %v392_v56  ;;  %v350_v36 = vmul.f32 %v345_v34, %v321_v24 }
 0x270   :  { %v471_v8 = vpop.eup %470 }
 0x271   :  { %v302_v9 = vmul.f32 %v471_v8, %v455_v21  ;;  %v221_v10 = vmul.f32 %v217_v5, %v217_v5  ;;  %v347_v21 = vmul.f32 %v629_v26, %v318_v14 }
 0x273   :  { %v315_v16 = vsub.f32 %v302_v9, %v400_v7  ;;  %v249_v55 = vmul.f32 %v627_v25, %v221_v10 }
 0x275   :  { %v319_v19 = vmul.f32 %v315_v16, %v315_v16  ;;  %v252_v20 = vadd.f32 %v249_v55, %v248_v13 }
 0x277   :  { %v348_v17 = vmul.f32 %v631_v27, %v319_v19  ;;  %v253_v32 = vadd.f32 %v252_v20, %v250_v22 }
 0x279   :  { %v351_v30 = vadd.f32 %v348_v17, %v347_v21  ;;  %v254_v29 = vadd.f32 %v253_v32, %v251_v35 }
 0x27b   :  { %v352_v37 = vadd.f32 %v351_v30, %v349_v28 }
 0x27d   :  { %v353_v25 = vadd.f32 %v352_v37, %v350_v36 }
 0x27f   :  { %v354_v38 = vadd.f32 %v353_v25, %v254_v29 }
 0x281   :  { %355 = vst.msk [vmem:[#allocation3] sm:$0xff] %vm151_vm1, %v354_v38 }
 0x282   :  { %483 = shalt.err (!%p480_p4)
}
 0x283   :  { %s484_s30 = scalar_lea.hbm %s678_s5, 128 }
 0x284   :  { %p485_p5 = scmp.ne.s32.totalorder %s678_s5, %s484_s30  ;;  %p488_p6 = scmp.lt.u32.totalorder %s484_s30, %s678_s5 }
 0x286   :  { %p490_p7 = pnand %p488_p6, %p485_p5 }
 0x288   :  { %493 = shalt.err (!%p490_p7)
}
 0x289   :  { %365 = dma.vmem_to_hbm [thread:$0]  %s363_s27, 128, %s678_s5, [#allocation4]  }
 0x28a   :  { %494 = dma.done.wait [#allocation4], 128  }
 0x28b   :  { %495 = vsyncadd [#allocation4], 4294967168 }
 0x28c   :  { %369 = vsyncpa [#allocation4], 1 }

</bundles_post_ra>
